<compile_context>
chip_gen: v6e
topology: v6e:2x2x1
jax: 0.10.0
libtpu: 0.0.40
codegen_flags: <defaults>
</compile_context>

<pallas_src>
import functools
import math

import jax
import jax.numpy as jnp
from jax.experimental import pallas as pl
from jax.experimental.pallas import tpu as pltpu

LANE = 128
SUBLANE = 8
F32 = 4  # bytes


def _round_up(x, m):
    return (x + m - 1) // m * m


def _pad2d(a, rows, cols):
    return jnp.pad(a, ((0, rows - a.shape[0]), (0, cols - a.shape[1])))


def _vmem_capacity():
    """Per-core physical VMEM (generation-aware), conservative fallback = 64 MiB."""
    try:
        cap = int(pltpu.get_tpu_info().vmem_capacity_bytes)
    except Exception:  # not on TPU / API unavailable
        cap = 64 << 20
    return min(max(cap, 32 << 20), 128 << 20)


# --------------------------------------------------------------------------- #
# Pass 1: fused attention pooling + folded (Wv @ W1) + ReLU + BN partial stats
# --------------------------------------------------------------------------- #
def _attn_pool_fc1_kernel(x_ref, wkq_ref, wv1_ref, bv1_ref, h1_ref, stats_ref,
                          *, n_valid, tile_n, inv_sqrt_d):
    x = x_ref[...]                                      # (TILE_N, L, Dp), compute dtype
    tn, L, Dp = x.shape

    # --- fused attention score on the MXU: x @ [wkq | 0 ... 0].
    #     Only lane 0 of the weight column block is nonzero, so a cheap 128-lane
    #     reduce recovers the scalar score exactly (no full-Dp VPU/XLU work).
    s_blk = jnp.dot(x.reshape(tn * L, Dp), wkq_ref[...],
                    preferred_element_type=jnp.float32)            # (TILE_N*L, 128)
    s = jnp.sum(s_blk, axis=-1, keepdims=True).reshape(tn, L, 1) * inv_sqrt_d

    # --- softmax over the sequence axis L (exact, f32)
    m = jnp.max(s, axis=1, keepdims=True)
    e = jnp.exp(s - m)
    attn = e / jnp.sum(e, axis=1, keepdims=True)                   # (TILE_N, L, 1)

    # --- pooling commutes with the V projection (softmax rows sum to 1):
    #       sum_l a_l (x_l Wv + bv) == (sum_l a_l x_l) Wv + bv
    pooled = jnp.sum(attn * x, axis=1)                             # (TILE_N, Dp), f32

    # --- folded (Wv @ W1) projection + bias + ReLU -> h1
    wv1 = wv1_ref[...]
    h1 = jnp.dot(pooled.astype(wv1.dtype), wv1,
                 preferred_element_type=jnp.float32) + bv1_ref[...]
    h1 = jnp.maximum(h1, 0.0)                                      # (TILE_N, Hp), f32
    h1_ref[...] = h1.astype(h1_ref.dtype)

    # --- per-tile BatchNorm partials; batch-padding rows are masked out so they
    #     cannot contaminate the training-mode batch statistics.
    row = pl.program_id(0) * tile_n + jax.lax.broadcasted_iota(jnp.int32, (tn, 1), 0)
    h1m = jnp.where(row < n_valid, h1, 0.0)
    ssum = jnp.sum(h1m, axis=0, keepdims=True)                     # (1, Hp)
    ssq = jnp.sum(h1m * h1m, axis=0, keepdims=True)                # (1, Hp)
    stats_ref[:, 0:1, :] = ssum[None]
    stats_ref[:, 1:2, :] = ssq[None]


# --------------------------------------------------------------------------- #
# Pass 2: folded BatchNorm + Linear + ReLU + head
# --------------------------------------------------------------------------- #
def _bn_mlp_head_kernel(h1_ref, scale_ref, shift_ref, w2_ref, b2_ref,
                        w3_ref, b3_ref, out_ref):
    h1 = h1_ref[...].astype(jnp.float32)
    hbn = h1 * scale_ref[...] + shift_ref[...]          # BatchNorm folded to scale/shift
    w2 = w2_ref[...]
    h2 = jnp.dot(hbn.astype(w2.dtype), w2,
                 preferred_element_type=jnp.float32) + b2_ref[...]
    h2 = jnp.maximum(h2, 0.0)
    w3 = w3_ref[...]
    y = jnp.dot(h2.astype(w3.dtype), w3,
                preferred_element_type=jnp.float32) + b3_ref[...]
    out_ref[...] = y.astype(out_ref.dtype)


# --------------------------------------------------------------------------- #
# Wrapper
# --------------------------------------------------------------------------- #
def intent_classifier_forward(x, params, n_intent_classes, *,
                              tile_n=None, compute_dtype=jnp.bfloat16):
    """x: (N, L, d_model) float32 encoder hidden states.
    Returns (N, n_intent_classes, 2) float32."""
    N, L, D = x.shape
    H = params["w1"].shape[1]
    C2 = n_intent_classes * 2
    Dp, Hp, C2p = _round_up(D, LANE), _round_up(H, LANE), _round_up(C2, LANE)
    cdt = jnp.dtype(compute_dtype)
    itemsize = cdt.itemsize

    # --- algebraic folds (exact up to float reassociation) ---------------------
    wkq = params["wk"] @ params["wq"]                      # (D, 1): Wk folded into query
    wv1 = params["wv"] @ params["w1"]                      # (D, H): Wv folded into FC1
    bv1 = params["bv"] @ params["w1"] + params["b1"]       # (1, H)

    # --- lane-padded weights (zero padding keeps the math exact) ---------------
    wkq_p = _pad2d(wkq, Dp, LANE).astype(cdt)              # only column 0 nonzero
    wv1_p = _pad2d(wv1, Dp, Hp).astype(cdt)
    bv1_p = _pad2d(bv1, 1, Hp).astype(jnp.float32)
    gamma_p = _pad2d(params["gamma"], 1, Hp).astype(jnp.float32)
    beta_p = _pad2d(params["beta"], 1, Hp).astype(jnp.float32)
    w2_p = _pad2d(params["w2"], Hp, Hp).astype(cdt)
    b2_p = _pad2d(params["b2"], 1, Hp).astype(jnp.float32)
    w3_p = _pad2d(params["w3"], Hp, C2p).astype(cdt)
    b3_p = _pad2d(params["b3"], 1, C2p).astype(jnp.float32)

    # --- generation-aware VMEM budgeting (pass 1) -------------------------------
    vmem_cap = _vmem_capacity()
    usable = max(24 << 20, vmem_cap - (16 << 20))          # leave >=16 MiB headroom
    w1_bytes = sum(int(a.size) * a.dtype.itemsize for a in (wkq_p, wv1_p, bv1_p))
    per_row1 = (2 * L * Dp * itemsize                      # x stream (double-buffered)
                + L * Dp * F32                             # attn-weighted x product
                + L * LANE * F32                           # score matmul block
                + 2 * Hp * itemsize                        # h1 output (double-buffered)
                + (Dp + 2 * Hp) * F32)                     # pooled / h1 f32 temporaries
    budget1 = max(SUBLANE * per_row1, usable - 2 * w1_bytes - (2 << 20))
    tile_cap = max(SUBLANE, budget1 // per_row1 // SUBLANE * SUBLANE)

    if tile_n is None:
        tile_n = min(tile_cap, 1024, _round_up(N, SUBLANE))
        if N > SUBLANE and tile_n >= N:
            # keep >= 2 tiles so dual-TensorCore parts (v7x) shard the parallel grid
            tile_n = _round_up((N + 1) // 2, SUBLANE)
    tile_n = max(SUBLANE, _round_up(int(tile_n), SUBLANE))
    Np = _round_up(N, tile_n)
    n_tiles = Np // tile_n

    x_p = jnp.pad(x, ((0, Np - N), (0, 0), (0, Dp - D))).astype(cdt)

    def _limit(weight_bytes, stream_bytes):
        # weights are counted x2: Pallas double-buffers every input BlockSpec.
        need = 2 * weight_bytes + stream_bytes + (4 << 20)
        return int(min(max(need, 24 << 20), vmem_cap - (8 << 20)))

    const2d = lambda i: (0, 0)

    cparams1 = pltpu.CompilerParams(
        dimension_semantics=("parallel",),                 # batch tiles are independent
        vmem_limit_bytes=_limit(w1_bytes, tile_n * per_row1))

    # ---- Pass 1: attention pooling + folded FC1 + per-tile BN partials ----
    h1, stats = pl.pallas_call(
        functools.partial(_attn_pool_fc1_kernel, n_valid=N, tile_n=tile_n,
                          inv_sqrt_d=1.0 / math.sqrt(D)),
        grid=(n_tiles,),
        in_specs=[
            pl.BlockSpec((tile_n, L, Dp), lambda i: (i, 0, 0)),   # x: streamed
            pl.BlockSpec((Dp, LANE), const2d),                    # folded Wk@wq column
            pl.BlockSpec((Dp, Hp), const2d),                      # folded Wv@W1
            pl.BlockSpec((1, Hp), const2d),                       # folded bias
        ],
        out_specs=(
            pl.BlockSpec((tile_n, Hp), lambda i: (i, 0)),         # h1 tiles
            pl.BlockSpec((1, 2, Hp), lambda i: (i, 0, 0)),        # per-tile sum/sumsq
        ),
        out_shape=(
            jax.ShapeDtypeStruct((Np, Hp), cdt),
            jax.ShapeDtypeStruct((n_tiles, 2, Hp), jnp.float32),
        ),
        compiler_params=cparams1,
    )(x_p, wkq_p, wv1_p, bv1_p)

    # ---- Tiny cross-tile reduction + BN fold (batch statistics, biased var) ----
    ssum = jnp.sum(stats[:, 0, :], axis=0)
    ssq = jnp.sum(stats[:, 1, :], axis=0)
    mean = ssum / N
    var = jnp.maximum(ssq / N - mean * mean, 0.0)
    inv_std = jax.lax.rsqrt(var + 1e-5)
    scale = gamma_p * inv_std[None, :]                     # (1, Hp)
    shift = beta_p - mean[None, :] * scale                 # (1, Hp)

    # ---- Pass 2 sizing: collapse to a single big-M step whenever it fits VMEM ----
    w2_bytes = sum(int(a.size) * a.dtype.itemsize
                   for a in (scale, shift, w2_p, b2_p, w3_p, b3_p))
    per_row2 = (2 * Hp * itemsize                          # h1 stream (double-buffered)
                + 2 * C2p * F32                            # output (double-buffered)
                + (3 * Hp + C2p) * F32)                    # hbn / h2 / y temporaries
    budget2 = max(SUBLANE * per_row2, usable - 2 * w2_bytes - (2 << 20))
    if Np * per_row2 <= budget2:
        tile_n2, n_tiles2 = Np, 1
    else:
        tile_n2, n_tiles2 = tile_n, n_tiles

    cparams2 = pltpu.CompilerParams(
        dimension_semantics=("parallel",),
        vmem_limit_bytes=_limit(w2_bytes, tile_n2 * per_row2))

    out = pl.pallas_call(
        _bn_mlp_head_kernel,
        grid=(n_tiles2,),
        in_specs=[
            pl.BlockSpec((tile_n2, Hp), lambda i: (i, 0)),        # h1
            pl.BlockSpec((1, Hp), const2d),                       # BN scale
            pl.BlockSpec((1, Hp), const2d),                       # BN shift
            pl.BlockSpec((Hp, Hp), const2d),                      # W2
            pl.BlockSpec((1, Hp), const2d),                       # b2
            pl.BlockSpec((Hp, C2p), const2d),                     # W3
            pl.BlockSpec((1, C2p), const2d),                      # b3
        ],
        out_specs=pl.BlockSpec((tile_n2, C2p), lambda i: (i, 0)),
        out_shape=jax.ShapeDtypeStruct((Np, C2p), jnp.float32),
        compiler_params=cparams2,
    )(h1, scale, shift, w2_p, b2_p, w3_p, b3_p)

    return out[:N, :C2].reshape(N, n_intent_classes, 2)


# --------------------------------------------------------------------------- #
# Parameters + pure-JAX reference
# --------------------------------------------------------------------------- #
def init_params(key, d_model, hidden, n_intent_classes):
    """Deterministic synthetic parameters.  Linear weights are stored pre-transposed
    as (in, out) so y = x @ W + b matches PyTorch's x @ W.T + b."""
    c2 = n_intent_classes * 2
    ks = jax.random.split(key, 6)

    def lin(k, fan_in, fan_out):
        bound = 1.0 / math.sqrt(fan_in)
        kw, kb = jax.random.split(k)
        w = jax.random.uniform(kw, (fan_in, fan_out), jnp.float32, -bound, bound)
        b = jax.random.uniform(kb, (1, fan_out), jnp.float32, -bound, bound)
        return w, b

    wk, bk = lin(ks[0], d_model, d_model)
    wq, bq = lin(ks[1], d_model, 1)
    wv, bv = lin(ks[2], d_model, d_model)
    w1, b1 = lin(ks[3], d_model, hidden)
    w2, b2 = lin(ks[4], hidden, hidden)
    w3, b3 = lin(ks[5], hidden, c2)
    gamma = jnp.ones((1, hidden), jnp.float32)
    beta = jnp.zeros((1, hidden), jnp.float32)
    return dict(wk=wk, bk=bk, wq=wq, bq=bq, wv=wv, bv=bv,
                w1=w1, b1=b1, gamma=gamma, beta=beta,
                w2=w2, b2=b2, w3=w3, b3=b3)


def reference_forward(x, p, n_intent_classes):
    """Pure-JAX reference mirroring the PyTorch module exactly."""
    D = x.shape[-1]
    k = jnp.einsum("nld,de->nle", x, p["wk"]) + p["bk"]
    s = (jnp.einsum("nld,do->nlo", k, p["wq"]) + p["bq"]) / jnp.sqrt(jnp.float32(D))
    a = jax.nn.softmax(s, axis=1)
    v = jnp.einsum("nld,de->nle", x, p["wv"]) + p["bv"]
    pooled = jnp.sum(a * v, axis=1)
    h1 = jnp.maximum(pooled @ p["w1"] + p["b1"], 0.0)
    mean = jnp.mean(h1, axis=0, keepdims=True)
    var = jnp.mean((h1 - mean) ** 2, axis=0, keepdims=True)
    hbn = (h1 - mean) / jnp.sqrt(var + 1e-5) * p["gamma"] + p["beta"]
    h2 = jnp.maximum(hbn @ p["w2"] + p["b2"], 0.0)
    y = h2 @ p["w3"] + p["b3"]
    return y.reshape(x.shape[0], n_intent_classes, 2)


if __name__ == "__main__":
    # Small shapes consistent with the module's forward:
    # N=12 sentences, L=8 tokens, d_model=32 (stand-in for T5's 512),
    # intent_hidden_dim=32, n_intent_classes=8.  tile_n=8 exercises the batch grid
    # (2 tiles) and the masked-batch-padding path (12 -> 16 rows).
    N, L, D = 12, 8, 32
    HIDDEN, N_CLASSES = 32, 8

    key = jax.random.PRNGKey(0)
    k_x, k_p = jax.random.split(key)
    x = jax.random.normal(k_x, (N, L, D), jnp.float32)    # encoder hidden-state surrogate
    params = init_params(k_p, D, HIDDEN, N_CLASSES)

    ref = reference_forward(x, params, N_CLASSES)

    # f32 compute path: tight numerical check against the reference.
    out = intent_classifier_forward(x, params, N_CLASSES, tile_n=8,
                                    compute_dtype=jnp.float32)
    out = jax.block_until_ready(out)
    assert out.shape == (N, N_CLASSES, 2), out.shape
    assert jnp.allclose(out, ref, atol=1e-3, rtol=1e-3), "f32 kernel mismatch vs reference"

    # Default path (bf16 compute, auto generation-aware tiling): loose sanity check.
    out_bf16 = jax.block_until_ready(intent_classifier_forward(x, params, N_CLASSES))
    assert out_bf16.shape == (N, N_CLASSES, 2), out_bf16.shape
    assert jnp.allclose(out_bf16, ref, atol=1e-1, rtol=1e-1), "bf16 kernel mismatch vs reference"

    print("KERNEL_OK")
</pallas_src>

<mosaic_0001>
module attributes {stable_mosaic.version = 11 : i64} {
  func.func @_attn_pool_fc1_kernel(%arg0: i32, %arg1: memref<8x8x128xf32, #tpu.memory_space<vmem>>, %arg2: memref<128x128xf32, #tpu.memory_space<vmem>>, %arg3: memref<128x128xf32, #tpu.memory_space<vmem>>, %arg4: memref<1x128xf32, #tpu.memory_space<vmem>>, %arg5: memref<8x128xf32, #tpu.memory_space<vmem>>, %arg6: memref<1x2x128xf32, #tpu.memory_space<vmem>>) attributes {dimension_semantics = [#tpu.dimension_semantics<parallel>], iteration_bounds = array<i64: 2>, scalar_prefetch = 0 : i64, scratch_operands = 0 : i64, tpu.core_type = #tpu.core_type<tc>, window_params = [{transform_indices = @transform_0, window_bounds = array<i64: 8, 8, 128>}, {pipeline_mode = #tpu.pipeline_mode<synchronous>, transform_indices = @transform_1, window_bounds = array<i64: 128, 128>}, {pipeline_mode = #tpu.pipeline_mode<synchronous>, transform_indices = @transform_2, window_bounds = array<i64: 128, 128>}, {pipeline_mode = #tpu.pipeline_mode<synchronous>, transform_indices = @transform_3, window_bounds = array<i64: 1, 128>}, {transform_indices = @transform_4, window_bounds = array<i64: 8, 128>}, {transform_indices = @transform_5, window_bounds = array<i64: 1, 2, 128>}]} {
    %c0 = arith.constant 0 : index
    %c0_0 = arith.constant 0 : index
    %c0_1 = arith.constant 0 : index
    %0 = vector.load %arg1[%c0, %c0_0, %c0_1] : memref<8x8x128xf32, #tpu.memory_space<vmem>>, vector<8x8x128xf32>
    %1 = vector.shape_cast %0 : vector<8x8x128xf32> to vector<64x128xf32>
    %c0_2 = arith.constant 0 : index
    %c0_3 = arith.constant 0 : index
    %2 = vector.load %arg2[%c0_2, %c0_3] : memref<128x128xf32, #tpu.memory_space<vmem>>, vector<128x128xf32>
    %cst = arith.constant dense<0.000000e+00> : vector<64x128xf32>
    %3 = tpu.matmul %1, %2, %cst {dimension_numbers = #tpu.dot_dimension_numbers<[1], [0], [0], [1], [0, 0, 1, 1], [], []>} : vector<64x128xf32>, vector<128x128xf32>, vector<64x128xf32> -> vector<64x128xf32>
    %cst_4 = arith.constant dense<0.000000e+00> : vector<64xf32>
    %4 = vector.multi_reduction <add>, %3, %cst_4 [1] : vector<64x128xf32> to vector<64xf32>
    %5 = vector.shape_cast %4 : vector<64xf32> to vector<64x1xf32>
    %6 = vector.shape_cast %5 : vector<64x1xf32> to vector<8x8x1xf32>
    %cst_5 = arith.constant 0.176776692 : f32
    %7 = vector.broadcast %cst_5 : f32 to vector<8x8x1xf32>
    %8 = arith.mulf %6, %7 : vector<8x8x1xf32>
    %cst_6 = arith.constant dense<0xFF800000> : vector<8x1xf32>
    %9 = vector.multi_reduction <maximumf>, %8, %cst_6 [1] : vector<8x8x1xf32> to vector<8x1xf32>
    %10 = vector.shape_cast %9 : vector<8x1xf32> to vector<8x1x1xf32>
    %11 = vector.broadcast %10 : vector<8x1x1xf32> to vector<8x8x1xf32>
    %12 = arith.subf %8, %11 : vector<8x8x1xf32>
    %13 = math.exp %12 : vector<8x8x1xf32>
    %cst_7 = arith.constant dense<0.000000e+00> : vector<8x1xf32>
    %14 = vector.multi_reduction <add>, %13, %cst_7 [1] : vector<8x8x1xf32> to vector<8x1xf32>
    %15 = vector.shape_cast %14 : vector<8x1xf32> to vector<8x1x1xf32>
    %16 = vector.broadcast %15 : vector<8x1x1xf32> to vector<8x8x1xf32>
    %17 = arith.divf %13, %16 : vector<8x8x1xf32>
    %18 = vector.broadcast %17 : vector<8x8x1xf32> to vector<8x8x128xf32>
    %19 = arith.mulf %18, %0 : vector<8x8x128xf32>
    %cst_8 = arith.constant dense<0.000000e+00> : vector<8x128xf32>
    %20 = vector.multi_reduction <add>, %19, %cst_8 [1] : vector<8x8x128xf32> to vector<8x128xf32>
    %c0_9 = arith.constant 0 : index
    %c0_10 = arith.constant 0 : index
    %21 = vector.load %arg3[%c0_9, %c0_10] : memref<128x128xf32, #tpu.memory_space<vmem>>, vector<128x128xf32>
    %cst_11 = arith.constant dense<0.000000e+00> : vector<8x128xf32>
    %22 = tpu.matmul %20, %21, %cst_11 {dimension_numbers = #tpu.dot_dimension_numbers<[1], [0], [0], [1], [0, 0, 1, 1], [], []>} : vector<8x128xf32>, vector<128x128xf32>, vector<8x128xf32> -> vector<8x128xf32>
    %c0_12 = arith.constant 0 : index
    %c0_13 = arith.constant 0 : index
    %23 = vector.load %arg4[%c0_12, %c0_13] : memref<1x128xf32, #tpu.memory_space<vmem>>, vector<1x128xf32>
    %24 = vector.broadcast %23 : vector<1x128xf32> to vector<8x128xf32>
    %25 = arith.addf %22, %24 : vector<8x128xf32>
    %cst_14 = arith.constant 0.000000e+00 : f32
    %26 = vector.broadcast %cst_14 : f32 to vector<8x128xf32>
    %27 = arith.maximumf %25, %26 : vector<8x128xf32>
    %c0_15 = arith.constant 0 : index
    %c0_16 = arith.constant 0 : index
    %28 = vector.load %arg5[%c0_15, %c0_16] : memref<8x128xf32, #tpu.memory_space<vmem>>, vector<8x128xf32>
    tpu.vector_store %arg5[%c0_15, %c0_16], %27 {strides = array<i32>} : memref<8x128xf32, #tpu.memory_space<vmem>>, vector<8x128xf32>,
    %c8_i32 = arith.constant 8 : i32
    %29 = arith.muli %arg0, %c8_i32 : i32
    %30 = tpu.iota {dimensions = array<i32: 0>} : vector<8x1xi32>
    %31 = vector.broadcast %29 : i32 to vector<8x1xi32>
    %32 = arith.addi %31, %30 : vector<8x1xi32>
    %c12_i32 = arith.constant 12 : i32
    %33 = vector.broadcast %c12_i32 : i32 to vector<8x1xi32>
    %34 = arith.cmpi slt, %32, %33 : vector<8x1xi32>
    %cst_17 = arith.constant 0.000000e+00 : f32
    %35 = vector.shape_cast %34 : vector<8x1xi1> to vector<8x1xi1>
    %36 = vector.broadcast %35 : vector<8x1xi1> to vector<8x128xi1>
    %37 = vector.broadcast %cst_17 : f32 to vector<8x128xf32>
    %38 = arith.select %36, %27, %37 : vector<8x128xi1>, vector<8x128xf32>
    %cst_18 = arith.constant dense<0.000000e+00> : vector<128xf32>
    %39 = vector.multi_reduction <add>, %38, %cst_18 [0] : vector<8x128xf32> to vector<128xf32>
    %40 = vector.shape_cast %39 : vector<128xf32> to vector<1x128xf32>
    %41 = arith.mulf %38, %38 : vector<8x128xf32>
    %cst_19 = arith.constant dense<0.000000e+00> : vector<128xf32>
    %42 = vector.multi_reduction <add>, %41, %cst_19 [0] : vector<8x128xf32> to vector<128xf32>
    %43 = vector.shape_cast %42 : vector<128xf32> to vector<1x128xf32>
    %44 = vector.shape_cast %40 : vector<1x128xf32> to vector<1x1x128xf32>
    %c0_20 = arith.constant 0 : index
    %c0_21 = arith.constant 0 : index
    %c0_22 = arith.constant 0 : index
    %45 = vector.load %arg6[%c0_20, %c0_21, %c0_22] : memref<1x2x128xf32, #tpu.memory_space<vmem>>, vector<1x1x128xf32>
    tpu.vector_store %arg6[%c0_20, %c0_21, %c0_22], %44 {strides = array<i32>} : memref<1x2x128xf32, #tpu.memory_space<vmem>>, vector<1x1x128xf32>,
    %46 = vector.shape_cast %43 : vector<1x128xf32> to vector<1x1x128xf32>
    %c0_23 = arith.constant 0 : index
    %c1 = arith.constant 1 : index
    %c0_24 = arith.constant 0 : index
    %47 = vector.load %arg6[%c0_23, %c1, %c0_24] : memref<1x2x128xf32, #tpu.memory_space<vmem>>, vector<1x1x128xf32>
    tpu.vector_store %arg6[%c0_23, %c1, %c0_24], %46 {strides = array<i32>} : memref<1x2x128xf32, #tpu.memory_space<vmem>>, vector<1x1x128xf32>,
    return
  }
  func.func @transform_0(%arg0: i32) -> (i32, i32, i32) {
    %c0_i32 = arith.constant 0 : i32
    %c0_i32_0 = arith.constant 0 : i32
    %c0_i32_1 = arith.constant 0 : i32
    return %arg0, %c0_i32, %c0_i32_0 : i32, i32, i32
  }
  func.func @transform_1(%arg0: i32) -> (i32, i32) {
    %c0_i32 = arith.constant 0 : i32
    %c0_i32_0 = arith.constant 0 : i32
    %c0_i32_1 = arith.constant 0 : i32
    return %c0_i32, %c0_i32_0 : i32, i32
  }
  func.func @transform_2(%arg0: i32) -> (i32, i32) {
    %c0_i32 = arith.constant 0 : i32
    %c0_i32_0 = arith.constant 0 : i32
    %c0_i32_1 = arith.constant 0 : i32
    return %c0_i32, %c0_i32_0 : i32, i32
  }
  func.func @transform_3(%arg0: i32) -> (i32, i32) {
    %c0_i32 = arith.constant 0 : i32
    %c0_i32_0 = arith.constant 0 : i32
    %c0_i32_1 = arith.constant 0 : i32
    return %c0_i32, %c0_i32_0 : i32, i32
  }
  func.func @transform_4(%arg0: i32) -> (i32, i32) {
    %c0_i32 = arith.constant 0 : i32
    %c0_i32_0 = arith.constant 0 : i32
    return %arg0, %c0_i32 : i32, i32
  }
  func.func @transform_5(%arg0: i32) -> (i32, i32, i32) {
    %c0_i32 = arith.constant 0 : i32
    %c0_i32_0 = arith.constant 0 : i32
    %c0_i32_1 = arith.constant 0 : i32
    return %arg0, %c0_i32, %c0_i32_0 : i32, i32, i32
  }
}

</mosaic_0001>

<bundles_post_ra>
// kernel: tpu_custom_call.1
= control target key start
LH: loop header
LB: loop body
LE: loop exit
PB: predicated region body
PF: predicated region fallthrough
CT: control target
= control target key end

     0   :  { %11 = vsyncpa [#allocation3], 0  ;;  %s1694_s0 = inlined_call_operand.hbm [shape: f32[16,8,128], index: 0, kind: input, shape index: {}]   ;;  %s1695_s1 = inlined_call_operand.hbm [shape: f32[128,128], index: 1, kind: input, shape index: {}]   ;;  %s1696_s2 = inlined_call_operand.hbm [shape: f32[128,128], index: 2, kind: input, shape index: {}]   ;;  %s1697_s3 = inlined_call_operand.vmem [shape: f32[1,128], index: 3, kind: input, shape index: {}]   ;;  %s1698_s4 = inlined_call_operand.hbm [shape: f32[16,128], index: 4, kind: output, shape index: {0}]   ;;  %s1699_s5 = inlined_call_operand.hbm [shape: f32[2,2,128], index: 5, kind: output, shape index: {1}]  }
   0x1   :  { %13 = vsyncpa [#allocation3 + $0x1], 0 }
   0x2   :  { %14 = vsyncpa [#allocation6], 0 }
   0x3   :  { %15 = vsyncpa [#allocation4], 0 }
   0x4   :  { %17 = vsyncpa [#allocation4 + $0x1], 0 }
   0x5   :  { %18 = vsyncpa [#allocation10], 0 }
   0x6   :  { %20 = vsyncpa [#allocation10 + $0x1], 0  ;;  %s1394_s18 = smov 0   ;;  %s1396_s19 = smov 0  }
   0x7   :  { %s1398_s20 = smov 0   ;;  %s1400_s21 = smov 0  }
   0x8 LB: > { %s1415_s22 = sadd.s32 4294967295, %s1353_s21   ;;  %s924_s23 = sadd.s32 4294967294, %s1353_s21   ;;  %s1353_s21 = sphi %s1400_s21, %s1722_s21   ;;  %s1349_s20 = sphi %s1398_s20, %s1721_s20   ;;  %s1345_s19 = sphi %s1396_s19, %s1720_s19   ;;  %s1341_s18 = sphi %s1394_s18, %s1719_s18  }
   0x9   : > { %p46_p0 = scmp.ne.s32.totalorder %s1345_s19, %s1341_s18  ;;  %p1700_p1 = scmp.eq.s32.totalorder %s1415_s22, 0 }
   0xa   : > { %p133_p2 = scmp.eq.s32.totalorder %s1415_s22, 1  ;;  %p139_p3 = scmp.eq.s32.totalorder %s924_s23, 1 }
   0xb   : > { %p1424_p4 = por %p1700_p1, %p46_p0  ;;  %p925_p5 = scmp.ge.s32.totalorder %s1353_s21, 1 }
   0xc   : > { %p1429_p6 = por %p139_p3, %p46_p0  ;;  %p172_p7 = scmp.lt.s32.totalorder %s1353_s21, 3 }
   0xd   : > { %s1705_s24 = scalar_select %p1424_p4, 1, 0 }
   0xe   : > { %s1706_s25 = scalar_select %p1429_p6, 1, 0 }
   0xf   : > { %p1434_p8 = pnand %p925_p5, %p172_p7  ;;  %s1355_s27 = smov [#allocation5]  }
  0x10   : > { %s184_s28 = sshll.u32 %s1355_s27, 4  ;;  %s1356_s30 = smov [#allocation7]   ;;  %s185_s28 = int_to_ptr.vmem [resolvable:$true] %s184_s28 }
  0x11   : > { %s1707_s26 = scalar_select %p1434_p8, 1, 0 }
  0x12   : > { %p1081_p9 = pneg %p1434_p8  ;;  %s197_s6 = sshll.u32 %s1356_s30, 4  ;;  %s198_s6 = int_to_ptr.vmem [resolvable:$true] %s197_s6 }
  0x13   : > { %s1186_s7 = scalar_lea.vmem %s185_s28, 2048  ;;  %p1194_p5 = scmp.lt.s32.totalorder %s185_s28, %s185_s28 }
  0x14   : > { %p1443_p11 = pnand %p1081_p9, %p1700_p1  ;;  %p1187_p13 = scmp.ne.s32.totalorder %s185_s28, %s1186_s7 }
  0x15   : > { %p1195_p7 = scmp.lt.s32.totalorder %s1186_s7, %s1186_s7 }
  0x16   : > { %p1177_p12 = pneg %p1443_p11 }
  0x17   : > { %p1196_p10 = por %p1195_p7, %p1194_p5 }
  0x18   : > { %p1189_p0 = pnand %p1187_p13, %p1177_p12 }
  0x1a   : > { %p1190_p3 = pneg %p1189_p0 }
  0x1c   : > { %p1197_p9 = pnand %p1196_p10, %p1190_p3 }
  0x1e   : > { %1200 = shalt.err (!%p1197_p9)
}
  0x1f   : > { %s1701_s8 = smov 128   ;;  %s1358_s9 = smov 8  }
  0x20   : > { %1084 = dma.hbm_to_vmem [thread:$0]  (!%p1443_p11), %s1695_s1, 2048, %s185_s28, [#allocation6], %s1701_s8, %s1701_s8, %s1358_s9  }
  0x21   : > { %s1212_s12 = scalar_lea.vmem %s198_s6, 2048  ;;  %p1220_p10 = scmp.lt.s32.totalorder %s198_s6, %s198_s6 }
  0x22   : > { %p1213_p13 = scmp.ne.s32.totalorder %s198_s6, %s1212_s12  ;;  %p1221_p3 = scmp.lt.s32.totalorder %s1212_s12, %s1212_s12 }
  0x24   : > { %p1215_p0 = pnand %p1213_p13, %p1177_p12  ;;  %p1222_p7 = por %p1221_p3, %p1220_p10 }
  0x26   : > { %p1216_p5 = pneg %p1215_p0 }
  0x28   : > { %p1223_p9 = pnand %p1222_p7, %p1216_p5 }
  0x2a   : > { %1226 = shalt.err (!%p1223_p9)
}
  0x2b   : > { %1087 = dma.hbm_to_vmem [thread:$0]  (!%p1443_p11), %s1696_s2, 2048, %s198_s6, [#allocation6], %s1701_s8, %s1701_s8, %s1358_s9  }
  0x2c   : > { %s1472_s15 = sadd.s32 1, %s1353_s21   ;;  %s33_s16 = sadd.s32 1, %s1349_s20 }
  0x2d   : > { %s30_s17 = ssub.s32 %s1353_s21, %s1472_s15  ;;  %p40_p12 = scmp.ne.s32.totalorder %s1349_s20, %s1345_s19 }
  0x2e   : > { %p31_p13 = scmp.eq.s32.totalorder %s30_s17, 0  ;;  %p41_p0 = scmp.eq.s32.totalorder %s1353_s21, 0 }
  0x2f   : > { %p1482_p5 = por %p133_p2, %p40_p12  ;;  %p1101_p10 = scmp.lt.s32.totalorder %s1353_s21, 2 }
  0x30   : > { %s1488_s27 = scalar_select %p31_p13, %s1349_s20, %s33_s16  }
  0x31   : > { %s1709_s23 = scalar_select %p1482_p5, 1, 0 }
  0x32   : > { %p42_p3 = por %p41_p0, %p40_p12  ;;  %s214_s28 = sand.u32 1, %s1349_s20  }
  0x33   : > { %s929_s29 = sshll.u32 %s214_s28, 6  ;;  %s946_s30 = sshll.u32 %s1353_s21, 10 }
  0x34   : > { %s1495_s10 = scalar_lea.hbm %s1694_s0, %s946_s30  ;;  %s218_s11 = scalar_lea.vmem [#allocation2], %s929_s29 }
  0x35   : > { %s225_s12 = sshll.u32 %s218_s11, 4  ;;  %p1499_p2 = pnand %p1101_p10, %p42_p3  ;;  %s1497_s12 = int_to_ptr.vmem [resolvable:$true] %s225_s12 }
  0x36   : > { %s1503_s14 = scalar_lea.sflag [#allocation3], %s214_s28  ;;  %s1227_s16 = scalar_lea.hbm %s1495_s10, 1024 }
  0x37   : > { %p1228_p11 = scmp.ne.s32.totalorder %s1495_s10, %s1227_s16  ;;  %p1229_p7 = pneg %p1499_p2 }
  0x38   : > { %s1232_s29 = scalar_lea.hbm %s1694_s0, 2048  ;;  %p1233_p13 = scmp.lt.s32.totalorder %s1495_s10, %s1694_s0 }
  0x39   : > { %p1230_p9 = pnand %p1229_p7, %p1228_p11  ;;  %p1234_p0 = scmp.lt.s32.totalorder %s1232_s29, %s1227_s16 }
  0x3b   : > { %p1231_p12 = pneg %p1230_p9  ;;  %p1235_p10 = por %p1234_p0, %p1233_p13 }
  0x3d   : > { %p1236_p3 = pnand %p1235_p10, %p1231_p12 }
  0x3f   : > { %1239 = shalt.err (!%p1236_p3)
}
  0x40   : > { %s1240_s28 = scalar_lea.vmem %s1497_s12, 1024  ;;  %s1359_s11 = smov [#allocation2]  }
  0x41   : > { %p1241_p1 = scmp.ne.s32.totalorder %s1497_s12, %s1240_s28  ;;  %s1245_s8 = sshll.u32 %s1359_s11, 4  ;;  %s1246_s8 = int_to_ptr.vmem [resolvable:$false] %s1245_s8 }
  0x42   : > { %s1247_s17 = scalar_lea.vmem %s1246_s8, 2048  ;;  %p1248_p9 = scmp.lt.s32.totalorder %s1497_s12, %s1246_s8 }
  0x43   : > { %p1243_p6 = pnand %p1241_p1, %p1229_p7  ;;  %p1249_p5 = scmp.lt.s32.totalorder %s1247_s17, %s1240_s28 }
  0x45   : > { %p1244_p11 = pneg %p1243_p6  ;;  %p1250_p4 = por %p1249_p5, %p1248_p9 }
  0x47   : > { %p1251_p8 = pnand %p1250_p4, %p1244_p11 }
  0x49   : > { %1254 = shalt.err (!%p1251_p8)
}
  0x4a   : > { %s1711_s16 = smov 128   ;;  %p1712_p1 = scmp.ne.s32.totalorder %s1707_s26, 0 }
  0x4b   : > { %1091 = dma.hbm_to_vmem [thread:$0]  (!%p1499_p2), %s1495_s10, 1024, %s1497_s12, %s1503_s14, %s1711_s16, %s1711_s16, %s1358_s9  }
  0x4c   : > { %237 = sbr.rel (%p1712_p1) target bundleno = 777 (0x309), region = 36  ;;  %s1530_s30 = sand.u32 (!%p1712_p1), 1, %s1345_s19  }
  0x4d   : > { %s933_s8 = sshll.u32 (!%p1712_p1), %s1530_s30, 6  ;;  %s240_s29 = scalar_lea.sflag (!%p1712_p1), [#allocation3], %s1530_s30 }
  0x4e   : > { %s1534_s6 = scalar_lea.vmem (!%p1712_p1), [#allocation2], %s933_s8  ;;  %p1713_p4 = scmp.ne.s32.totalorder (!%p1712_p1), %s1705_s24, 0 }
  0x51   : > { %1324 = dma.done.wait (%p1713_p4), %s240_s29, 1024  }
  0x52   : > { %1326 = vsyncadd (%p1713_p4), %s240_s29, 4294966272  ;;  %p1714_p6 = scmp.eq.s32.totalorder %s1415_s22, 0 }
  0x54   : > { %1328 = dma.done.wait (%p1714_p6), [#allocation6], 4096   ;;  %p1715_p8 = pmov %p1714_p6 }
  0x55   : > { %v307_v0 = vld [vmem:[#allocation5 + $0x78] sm:$0xff]  ;;  %v306_v1 = vld [vmem:[#allocation5 + $0x70] sm:$0xff]  ;;  %v305_v2 = vld [vmem:[#allocation5 + $0x68] sm:$0xff]  ;;  %v1360_v33 = vmov 0.0   ;;  %vm1361_vm0 = vmmov 0   ;;  %vm660_vm1 = vcmask 1041409  }
  0x56   : > { %1330 = vsyncadd (%p1715_p8), [#allocation6], 4294963200  ;;  %988 = vmatprep.subr.mxu0 %v307_v0  ;;  %v304_v3 = vld [vmem:[#allocation5 + $0x60] sm:$0xff]  ;;  %v303_v5 = vld [vmem:[#allocation5 + $0x58] sm:$0xff]  ;;  %1032 = vmatprep.subr.mxu1 %v1360_v33  ;;  %vm662_vm2 = vcmask 1042434   ;;  %vm664_vm3 = vcmask 1043459  }
  0x57   : > { %989 = vmatpush3.msra.mxu0 %v307_v0  ;;  %v1545_v4 = vld [vmem:[%s1534_s6] sm:$0xff]  ;;  %v302_v6 = vld [vmem:[#allocation5 + $0x50] sm:$0xff]  ;;  %v301_v7 = vld [vmem:[#allocation5 + $0x48] sm:$0xff]  ;;  %1064 = vmatprep.mubr.msk.f32.mxu1 %vm1361_vm0, %v1360_v33  ;;  %vm666_vm4 = vcmask 1044484   ;;  %vm668_vm5 = vcmask 1045509   ;;  %vm670_vm6 = vcmask 1046534  }
  0x58   : > { %990 = vmatprep.subr.mxu0 %v306_v1  ;;  %1020 = vmatprep.mubr.f32.mxu0 %v1545_v4  ;;  %v300_v8 = vld [vmem:[#allocation5 + $0x40] sm:$0xff]  ;;  %v299_v9 = vld [vmem:[#allocation5 + $0x38] sm:$0xff]  ;;  %v298_v10 = vld [vmem:[#allocation5 + $0x30] sm:$0xff]  ;;  %vm672_vm7 = vcmask 1047559   ;;  %s939_s24 = sshll.u32 %s1415_s22, 3  ;;  %s936_s26 = sshll.u32 %s1530_s30, 3 }
  0x59   : > { %991 = vmatpush3.msra.mxu0 %v306_v1  ;;  %v297_v11 = vld [vmem:[#allocation5 + $0x28] sm:$0xff]  ;;  %v296_v12 = vld [vmem:[#allocation5 + $0x20] sm:$0xff]  ;;  %v295_v13 = vld [vmem:[#allocation5 + $0x18] sm:$0xff]  ;;  %s942_s12 = sshll.u32 %s1415_s22, 7  ;;  %s275_s13 = scalar_lea.vmem [#allocation8], %s936_s26 }
  0x5a   : > { %992 = vmatprep.subr.mxu0 %v305_v2  ;;  %v294_v14 = vld [vmem:[#allocation5 + $0x10] sm:$0xff]  ;;  %v293_v15 = vld [vmem:[#allocation5 + $0x8] sm:$0xff]  ;;  %v292_v16 = vld [vmem:[#allocation5] sm:$0xff]  ;;  %s790_s14 = sshll.u32 %s275_s13, 4  ;;  %s1633_s11 = scalar_lea.hbm %s1698_s4, %s942_s12  ;;  %s1635_s14 = int_to_ptr.vmem [resolvable:$true] %s790_s14 }
  0x5b   : > { %993 = vmatpush3.msra.mxu0 %v305_v2  ;;  %v1549_v17 = vld [vmem:[%s1534_s6 + $0x8] sm:$0xff]  ;;  %v1552_v18 = vld [vmem:[%s1534_s6 + $0x10] sm:$0xff]  ;;  %v1557_v19 = vld [vmem:[%s1534_s6 + $0x18] sm:$0xff]  ;;  %s772_s17 = scalar_lea.sflag [#allocation4], %s1530_s30  ;;  %s1255_s16 = scalar_lea.vmem %s1635_s14, 128 }
  0x5c   : > { %994 = vmatprep.subr.mxu0 %v304_v3  ;;  %v1560_v20 = vld [vmem:[%s1534_s6 + $0x20] sm:$0xff]  ;;  %v1565_v21 = vld [vmem:[%s1534_s6 + $0x28] sm:$0xff]  ;;  %v1568_v22 = vld [vmem:[%s1534_s6 + $0x30] sm:$0xff]  ;;  %p1256_p5 = scmp.ne.s32.totalorder %s1635_s14, %s1255_s16  ;;  %p1716_p2 = scmp.ne.s32.totalorder %s1709_s23, 0 }
  0x5d   : > { %995 = vmatpush3.msra.mxu0 %v304_v3  ;;  %v1573_v23 = vld [vmem:[%s1534_s6 + $0x38] sm:$0xff]  ;;  %v643_v34 = vld [vmem:[#allocation7 + $0x70] sm:$0xff]  ;;  %v642_v35 = vld [vmem:[#allocation7 + $0x68] sm:$0xff]  ;;  %s1362_s8 = smov [#allocation8]  }
  0x5e   : > { %996 = vmatprep.subr.mxu0 %v303_v5  ;;  %v644_v32 = vld [vmem:[#allocation7 + $0x78] sm:$0xff]  ;;  %v641_v36 = vld [vmem:[#allocation7 + $0x60] sm:$0xff]  ;;  %v639_v38 = vld [vmem:[#allocation7 + $0x50] sm:$0xff]  ;;  %p1257_p7 = pnand %p1256_p5, %p1716_p2  ;;  %s1259_s29 = sshll.u32 %s1362_s8, 4  ;;  %s1260_s29 = int_to_ptr.vmem [resolvable:$false] %s1259_s29 }
  0x5f   : > { %997 = vmatpush3.msra.mxu0 %v303_v5  ;;  %1033 = vmatpush3.msra.mxu1 %v644_v32  ;;  %v640_v37 = vld [vmem:[#allocation7 + $0x58] sm:$0xff]  ;;  %v638_v39 = vld [vmem:[#allocation7 + $0x48] sm:$0xff]  ;;  %v637_v40 = vld [vmem:[#allocation7 + $0x40] sm:$0xff]  ;;  %s1261_s6 = scalar_lea.vmem %s1260_s29, 256  ;;  %p1262_p13 = scmp.lt.s32.totalorder %s1635_s14, %s1260_s29 }
  0x60   : > { %998 = vmatprep.subr.mxu0 %v302_v6  ;;  %1034 = vmatprep.subr.mxu1 %v1360_v33  ;;  %v636_v41 = vld [vmem:[#allocation7 + $0x38] sm:$0xff]  ;;  %v635_v42 = vld [vmem:[#allocation7 + $0x30] sm:$0xff]  ;;  %v634_v43 = vld [vmem:[#allocation7 + $0x28] sm:$0xff]  ;;  %p1258_p12 = pneg %p1257_p7  ;;  %p1263_p0 = scmp.lt.s32.totalorder %s1261_s6, %s1255_s16 }
  0x61   : > { %999 = vmatpush3.msra.mxu0 %v302_v6  ;;  %1035 = vmatpush3.msra.mxu1 %v643_v34  ;;  %v633_v44 = vld [vmem:[#allocation7 + $0x20] sm:$0xff]  ;;  %v632_v45 = vld [vmem:[#allocation7 + $0x18] sm:$0xff]  ;;  %v631_v46 = vld [vmem:[#allocation7 + $0x10] sm:$0xff] }
  0x62   : > { %1000 = vmatprep.subr.mxu0 %v301_v7  ;;  %1036 = vmatprep.subr.mxu1 %v1360_v33  ;;  %v630_v47 = vld [vmem:[#allocation7 + $0x8] sm:$0xff]  ;;  %v629_v48 = vld [vmem:[#allocation7] sm:$0xff]  ;;  %p1264_p10 = por %p1263_p0, %p1262_p13 }
  0x63   : > { %1001 = vmatpush3.msra.mxu0 %v301_v7  ;;  %1037 = vmatpush3.msra.mxu1 %v642_v35 }
  0x64   : > { %1002 = vmatprep.subr.mxu0 %v300_v8  ;;  %1038 = vmatprep.subr.mxu1 %v1360_v33  ;;  %p1265_p3 = pnand %p1264_p10, %p1258_p12 }
  0x65   : > { %1003 = vmatpush3.msra.mxu0 %v300_v8  ;;  %1039 = vmatpush3.msra.mxu1 %v641_v36 }
  0x66   : > { %1004 = vmatprep.subr.mxu0 %v299_v9  ;;  %1040 = vmatprep.subr.mxu1 %v1360_v33 }
  0x67   : > { %1005 = vmatpush3.msra.mxu0 %v299_v9  ;;  %1041 = vmatpush3.msra.mxu1 %v640_v37 }
  0x68   : > { %1006 = vmatprep.subr.mxu0 %v298_v10  ;;  %1042 = vmatprep.subr.mxu1 %v1360_v33 }
  0x69   : > { %1007 = vmatpush3.msra.mxu0 %v298_v10  ;;  %1043 = vmatpush3.msra.mxu1 %v639_v38 }
  0x6a   : > { %1008 = vmatprep.subr.mxu0 %v297_v11  ;;  %1044 = vmatprep.subr.mxu1 %v1360_v33 }
  0x6b   : > { %1009 = vmatpush3.msra.mxu0 %v297_v11  ;;  %1045 = vmatpush3.msra.mxu1 %v638_v39 }
  0x6c   : > { %1010 = vmatprep.subr.mxu0 %v296_v12  ;;  %1046 = vmatprep.subr.mxu1 %v1360_v33 }
  0x6d   : > { %1011 = vmatpush3.msra.mxu0 %v296_v12  ;;  %1047 = vmatpush3.msra.mxu1 %v637_v40 }
  0x6e   : > { %1012 = vmatprep.subr.mxu0 %v295_v13  ;;  %1048 = vmatprep.subr.mxu1 %v1360_v33 }
  0x6f   : > { %1013 = vmatpush3.msra.mxu0 %v295_v13  ;;  %1049 = vmatpush3.msra.mxu1 %v636_v41 }
  0x70   : > { %1014 = vmatprep.subr.mxu0 %v294_v14  ;;  %1050 = vmatprep.subr.mxu1 %v1360_v33 }
  0x71   : > { %1015 = vmatpush3.msra.mxu0 %v294_v14  ;;  %1051 = vmatpush3.msra.mxu1 %v635_v42 }
  0x72   : > { %1016 = vmatprep.subr.mxu0 %v293_v15  ;;  %1052 = vmatprep.subr.mxu1 %v1360_v33 }
  0x73   : > { %1017 = vmatpush3.msra.mxu0 %v293_v15  ;;  %1053 = vmatpush3.msra.mxu1 %v634_v43 }
  0x74   : > { %1018 = vmatprep.subr.mxu0 %v292_v16  ;;  %1054 = vmatprep.subr.mxu1 %v1360_v33 }
  0x75   : > { %1019 = vmatpush3.msra.mxu0 %v292_v16  ;;  %1055 = vmatpush3.msra.mxu1 %v633_v44 }
  0x76   : > { %1021 = vmatmul.mubr.f32.vlgmr.msra.gmra.mxu0 %v1549_v17  ;;  %1056 = vmatprep.subr.mxu1 %v1360_v33 }
  0x77   : > { %1023 = vmatprep.mubr.f32.mxu0 %v1552_v18  ;;  %1057 = vmatpush3.msra.mxu1 %v632_v45 }
  0x78   : > { %1058 = vmatprep.subr.mxu1 %v1360_v33 }
  0x79   : > { %1059 = vmatpush3.msra.mxu1 %v631_v46 }
  0x7a   : > { %1024 = vmatmul.mubr.f32.gmra.mxu0 %v1557_v19  ;;  %1060 = vmatprep.subr.mxu1 %v1360_v33 }
  0x7b   : > { %1026 = vmatprep.mubr.f32.mxu0 %v1560_v20  ;;  %1061 = vmatpush3.msra.mxu1 %v630_v47 }
  0x7c   : > { %1062 = vmatprep.subr.mxu1 %v1360_v33 }
  0x7d   : > { %1063 = vmatpush3.msra.mxu1 %v629_v48 }
  0x7e   : > { %1027 = vmatmul.mubr.f32.gmra.mxu0 %v1565_v21 }
  0x7f   : > { %1029 = vmatprep.mubr.f32.mxu0 %v1568_v22 }
  0x82   : > { %1030 = vmatmul.mubr.f32.gmra.mxu0 %v1573_v23 }
 0x136   : > { %v1022_v24 = vpop.f32.mrf.mxu0 }
 0x137   : > { %415 = vadd.xlane.f32.xlu0 %v1022_v24 }
 0x138   : > { %v374_v25 = vpop.f32.mrf.mxu0 }
 0x13a   : > { %v1025_v26 = vpop.f32.mrf.mxu0 }
 0x13b   : > { %413 = vadd.xlane.f32.xlu0 %v374_v25  ;;  %419 = vadd.xlane.f32.xlu1 %v1025_v26 }
 0x13c   : > { %v384_v27 = vpop.f32.mrf.mxu0 }
 0x13e   : > { %v1028_v28 = vpop.f32.mrf.mxu0 }
 0x13f   : > { %417 = vadd.xlane.f32.xlu1 %v384_v27 }
 0x140   : > { %v394_v29 = vpop.f32.mrf.mxu0 }
 0x141   : > { %421 = vadd.xlane.f32.xlu0 %v394_v29 }
 0x142   : > { %v1031_v30 = vpop.f32.mrf.mxu0 }
 0x143   : > { %423 = vadd.xlane.f32.xlu1 %v1028_v28 }
 0x144   : > { %v404_v31 = vpop.f32.mrf.mxu0 }
 0x145   : > { %425 = vadd.xlane.f32.xlu0 %v404_v31 }
 0x147   : > { %427 = vadd.xlane.f32.xlu1 %v1031_v30 }
 0x1c0   : > { %v416_v49 = vpop.xlane.xlu0 %415 }
 0x1c1   : > { %v430_v50 = vmul.f32 0.17677669, %v416_v49 }
 0x1c3   : > { %v443_v51 = vrot.slane %v430_v50, 4 }
 0x1c4   : > { %v414_v52 = vpop.xlane.xlu0 %413  ;;  %v420_v53 = vpop.xlane.xlu1 %419 }
 0x1c5   : > { %v444_v54 = vmax.f32 %v430_v50, %v443_v51  ;;  %v429_v55 = vmul.f32 0.17677669, %v414_v52  ;;  %v432_v56 = vmul.f32 0.17677669, %v420_v53 }
 0x1c7   : > { %v445_v57 = vrot.slane %v444_v54, 2  ;;  %v437_v58 = vrot.slane %v429_v55, 4  ;;  %v455_v59 = vrot.slane %v432_v56, 4 }
 0x1c8   : > { %v418_v60 = vpop.xlane.xlu1 %417 }
 0x1c9   : > { %v446_v61 = vmax.f32 %v444_v54, %v445_v57  ;;  %v438_v62 = vmax.f32 %v429_v55, %v437_v58  ;;  %v456_v63 = vmax.f32 %v432_v56, %v455_v59  ;;  %v431_v0 = vmul.f32 0.17677669, %v418_v60 }
 0x1ca   : > { %v422_v1 = vpop.xlane.xlu0 %421 }
 0x1cb   : > { %v447_v2 = vrot.slane %v446_v61, 1  ;;  %v439_v3 = vrot.slane %v438_v62, 2  ;;  %v457_v5 = vrot.slane %v456_v63, 2  ;;  %v449_v6 = vrot.slane %v431_v0, 4 }
 0x1cc   : > { %v433_v7 = vmul.f32 0.17677669, %v422_v1  ;;  %v424_v8 = vpop.xlane.xlu1 %423 }
 0x1cd   : > { %v448_v9 = vmax.f32 %v446_v61, %v447_v2  ;;  %v440_v10 = vmax.f32 %v438_v62, %v439_v3  ;;  %v458_v11 = vmax.f32 %v456_v63, %v457_v5  ;;  %v450_v12 = vmax.f32 %v431_v0, %v449_v6 }
 0x1ce   : > { %v461_v13 = vrot.slane %v433_v7, 4  ;;  %v434_v14 = vmul.f32 0.17677669, %v424_v8  ;;  %v426_v15 = vpop.xlane.xlu0 %425 }
 0x1cf   : > { %v486_v16 = vsub.f32 %v430_v50, %v448_v9  ;;  %v441_v24 = vrot.slane %v440_v10, 1  ;;  %v459_v25 = vrot.slane %v458_v11, 1  ;;  %v451_v26 = vrot.slane %v450_v12, 2 }
 0x1d0   : > { %v462_v27 = vmax.f32 %v433_v7, %v461_v13  ;;  %v467_v28 = vrot.slane %v434_v14, 4  ;;  %v435_v29 = vmul.f32 0.17677669, %v426_v15  ;;  %v428_v30 = vpop.xlane.xlu1 %427 }
 0x1d1   : > { %v495_v31 = vmul.f32 1.442695, %v486_v16  ;;  %v442_v32 = vmax.f32 %v440_v10, %v441_v24  ;;  %v460_v33 = vmax.f32 %v458_v11, %v459_v25  ;;  %v452_v34 = vmax.f32 %v450_v12, %v451_v26 }
 0x1d2   : > { %v463_v35 = vrot.slane %v462_v27, 2  ;;  %v468_v36 = vmax.f32 %v434_v14, %v467_v28  ;;  %v473_v37 = vrot.slane %v435_v29, 4  ;;  %v436_v38 = vmul.f32 0.17677669, %v428_v30 }
 0x1d3   : > { %1143 = vpow2.f32 %v495_v31  ;;  %v485_v39 = vsub.f32 %v429_v55, %v442_v32  ;;  %v488_v40 = vsub.f32 %v432_v56, %v460_v33  ;;  %v453_v41 = vrot.slane %v452_v34, 1 }
 0x1d4   : > { %v464_v42 = vmax.f32 %v462_v27, %v463_v35  ;;  %v469_v43 = vrot.slane %v468_v36, 2  ;;  %v474_v44 = vmax.f32 %v435_v29, %v473_v37  ;;  %v479_v45 = vrot.slane %v436_v38, 4 }
 0x1d5   : > { %v493_v46 = vmul.f32 1.442695, %v485_v39  ;;  %v499_v47 = vmul.f32 1.442695, %v488_v40  ;;  %v454_v48 = vmax.f32 %v452_v34, %v453_v41 }
 0x1d6   : > { %v465_v49 = vrot.slane %v464_v42, 1  ;;  %v470_v50 = vmax.f32 %v468_v36, %v469_v43  ;;  %v475_v51 = vrot.slane %v474_v44, 2  ;;  %v480_v52 = vmax.f32 %v436_v38, %v479_v45 }
 0x1d7   : > { %1145 = vpow2.f32 %v493_v46  ;;  %v487_v53 = vsub.f32 %v431_v0, %v454_v48 }
 0x1d8   : > { %1147 = vpow2.f32 %v499_v47  ;;  %v466_v54 = vmax.f32 %v464_v42, %v465_v49  ;;  %v471_v57 = vrot.slane %v470_v50, 1  ;;  %v476_v58 = vmax.f32 %v474_v44, %v475_v51 }
 0x1d9   : > { %v497_v55 = vmul.f32 1.442695, %v487_v53  ;;  %v481_v56 = vrot.slane %v480_v52, 2 }
 0x1da   : > { %v489_v59 = vsub.f32 %v433_v7, %v466_v54  ;;  %v472_v60 = vmax.f32 %v470_v50, %v471_v57  ;;  %v477_v61 = vrot.slane %v476_v58, 1 }
 0x1db   : > { %1149 = vpow2.f32 %v497_v55  ;;  %v482_v62 = vmax.f32 %v480_v52, %v481_v56 }
 0x1dc   : > { %v501_v63 = vmul.f32 1.442695, %v489_v59  ;;  %v490_v1 = vsub.f32 %v434_v14, %v472_v60  ;;  %v478_v2 = vmax.f32 %v476_v58, %v477_v61 }
 0x1dd   : > { %v483_v3 = vrot.slane %v482_v62, 1 }
 0x1de   : > { %1151 = vpow2.f32 %v501_v63  ;;  %v503_v5 = vmul.f32 1.442695, %v490_v1  ;;  %v491_v6 = vsub.f32 %v435_v29, %v478_v2 }
 0x1df   : > { %v484_v8 = vmax.f32 %v482_v62, %v483_v3 }
 0x1e0   : > { %v1576_v0 = vpop.eup %1143  ;;  %1153 = vpow2.f32 %v503_v5  ;;  %v505_v9 = vmul.f32 1.442695, %v491_v6 }
 0x1e1   : > { %v515_v10 = vrot.slane %v1576_v0, 4  ;;  %v492_v11 = vsub.f32 %v436_v38, %v484_v8 }
 0x1e2   : > { %1155 = vpow2.f32 %v505_v9 }
 0x1e3   : > { %v516_v7 = vadd.f32 %v1576_v0, %v515_v10  ;;  %v507_v12 = vmul.f32 1.442695, %v492_v11 }
 0x1e4   : > { %v1580_v13 = vpop.eup %1145 }
 0x1e5   : > { %v1582_v14 = vpop.eup %1147  ;;  %v517_v15 = vrot.slane %v516_v7, 2  ;;  %v509_v16 = vrot.slane %v1580_v13, 4  ;;  %1157 = vpow2.f32 %v507_v12 }
 0x1e6   : > { %v527_v24 = vrot.slane %v1582_v14, 4 }
 0x1e7   : > { %v518_v25 = vadd.f32 %v517_v15, %v516_v7  ;;  %v510_v26 = vadd.f32 %v1580_v13, %v509_v16 }
 0x1e8   : > { %v1587_v27 = vpop.eup %1149  ;;  %v528_v28 = vadd.f32 %v1582_v14, %v527_v24 }
 0x1e9   : > { %v519_v29 = vrot.slane %v518_v25, 1  ;;  %v511_v30 = vrot.slane %v510_v26, 2  ;;  %v521_v31 = vrot.slane %v1587_v27, 4 }
 0x1ea   : > { %v529_v32 = vrot.slane %v528_v28, 2 }
 0x1eb   : > { %v1591_v33 = vpop.eup %1151  ;;  %v520_v34 = vadd.f32 %v519_v29, %v518_v25  ;;  %v512_v35 = vadd.f32 %v511_v30, %v510_v26  ;;  %v522_v36 = vadd.f32 %v1587_v27, %v521_v31 }
 0x1ec   : > { %v530_v37 = vadd.f32 %v529_v32, %v528_v28  ;;  %v533_v38 = vrot.slane %v1591_v33, 4 }
 0x1ed   : > { %v1595_v39 = vpop.eup %1153  ;;  %v513_v40 = vrot.slane %v512_v35, 1  ;;  %v523_v41 = vrot.slane %v522_v36, 2  ;;  %1159 = vrcp.f32 %v520_v34 }
 0x1ee   : > { %v534_v42 = vadd.f32 %v1591_v33, %v533_v38  ;;  %v539_v43 = vrot.slane %v1595_v39, 4  ;;  %v531_v44 = vrot.slane %v530_v37, 1 }
 0x1ef   : > { %v1599_v45 = vpop.eup %1155  ;;  %v514_v46 = vadd.f32 %v513_v40, %v512_v35  ;;  %v524_v47 = vadd.f32 %v523_v41, %v522_v36 }
 0x1f0   : > { %v545_v48 = vrot.slane %v1599_v45, 4  ;;  %v532_v49 = vadd.f32 %v531_v44, %v530_v37  ;;  %v535_v50 = vrot.slane %v534_v42, 2  ;;  %v540_v51 = vadd.f32 %v1595_v39, %v539_v43 }
 0x1f1   : > { %v525_v52 = vrot.slane %v524_v47, 1  ;;  %1161 = vrcp.f32 %v514_v46 }
 0x1f2   : > { %v1603_v53 = vpop.eup %1157  ;;  %v536_v54 = vadd.f32 %v535_v50, %v534_v42  ;;  %v541_v57 = vrot.slane %v540_v51, 2  ;;  %v546_v58 = vadd.f32 %v1599_v45, %v545_v48  ;;  %1163 = vrcp.f32 %v532_v49 }
 0x1f3   : > { %v526_v55 = vadd.f32 %v525_v52, %v524_v47  ;;  %v551_v56 = vrot.slane %v1603_v53, 4 }
 0x1f4   : > { %v537_v59 = vrot.slane %v536_v54, 1  ;;  %v542_v60 = vadd.f32 %v541_v57, %v540_v51  ;;  %v547_v61 = vrot.slane %v546_v58, 2 }
 0x1f5   : > { %v552_v62 = vadd.f32 %v1603_v53, %v551_v56  ;;  %1165 = vrcp.f32 %v526_v55 }
 0x1f6   : > { %v538_v63 = vadd.f32 %v537_v59, %v536_v54  ;;  %v543_v1 = vrot.slane %v542_v60, 1  ;;  %v548_v2 = vadd.f32 %v547_v61, %v546_v58 }
 0x1f7   : > { %v553_v3 = vrot.slane %v552_v62, 2 }
 0x1f8   : > { %v544_v5 = vadd.f32 %v543_v1, %v542_v60  ;;  %v549_v6 = vrot.slane %v548_v2, 1  ;;  %1167 = vrcp.f32 %v538_v63 }
 0x1f9   : > { %v554_v8 = vadd.f32 %v553_v3, %v552_v62 }
 0x1fa   : > { %v1160_v9 = vpop.eup %1159  ;;  %v550_v10 = vadd.f32 %v549_v6, %v548_v2  ;;  %1169 = vrcp.f32 %v544_v5 }
 0x1fb   : > { %v555_v11 = vrot.slane %v554_v8, 1  ;;  %v560_v7 = vmul.f32 %v1160_v9, %v1576_v0 }
 0x1fc   : > { %1171 = vrcp.f32 %v550_v10 }
 0x1fd   : > { %v556_v12 = vadd.f32 %v555_v11, %v554_v8  ;;  %v574_v15 = vmul.f32 %v560_v7, %v1549_v17 }
 0x1fe   : > { %v1162_v16 = vpop.eup %1161 }
 0x1ff   : > { %v1164_v24 = vpop.eup %1163  ;;  %v558_v25 = vmul.f32 %v1162_v16, %v1580_v13  ;;  %1173 = vrcp.f32 %v556_v12  ;;  %v587_v26 = vrot.slane %v574_v15, 4 }
 0x200   : > { %v564_v28 = vmul.f32 %v1164_v24, %v1582_v14 }
 0x201   : > { %v573_v29 = vmul.f32 %v558_v25, %v1545_v4  ;;  %v588_v30 = vadd.f32 %v587_v26, %v574_v15 }
 0x202   : > { %v1166_v31 = vpop.eup %1165  ;;  %v576_v32 = vmul.f32 %v564_v28, %v1557_v19 }
 0x203   : > { %v562_v0 = vmul.f32 %v1166_v31, %v1587_v27  ;;  %v581_v34 = vrot.slane %v573_v29, 4  ;;  %v589_v35 = vrot.slane %v588_v30, 2 }
 0x204   : > { %v599_v36 = vrot.slane %v576_v32, 4 }
 0x205   : > { %v1168_v17 = vpop.eup %1167  ;;  %v575_v37 = vmul.f32 %v562_v0, %v1552_v18  ;;  %v582_v38 = vadd.f32 %v581_v34, %v573_v29  ;;  %v590_v19 = vadd.f32 %v589_v35, %v588_v30 }
 0x206   : > { %v566_v13 = vmul.f32 %v1168_v17, %v1591_v33  ;;  %v600_v40 = vadd.f32 %v599_v36, %v576_v32  ;;  %v748_v36 = vlaneseq }
 0x207   : > { %v1170_v41 = vpop.eup %1169  ;;  %v583_v14 = vrot.slane %v582_v38, 2  ;;  %v593_v42 = vrot.slane %v575_v37, 4  ;;  %v591_v57 = vrot.slane %v590_v19, 1 }
 0x208   : > { %v568_v4 = vmul.f32 %v1170_v41, %v1595_v39  ;;  %v577_v43 = vmul.f32 %v566_v13, %v1560_v20  ;;  %v601_v44 = vrot.slane %v600_v40, 2  ;;  %v749_v17 = vshrl.u32 %v748_v36, 7 }
 0x209   : > { %v1172_v27 = vpop.eup %1171  ;;  %v584_v46 = vadd.f32 %v583_v14, %v582_v38  ;;  %v594_v47 = vadd.f32 %v593_v42, %v575_v37  ;;  %v592_v63 = vadd.f32 %v591_v57, %v590_v19  ;;  %v750_v37 = vstv %s939_s24  ;;  %v938_v38 = vld [vmem:[%s1697_s3] ss:$0 sm:$0xff] }
 0x20a   : > { %v570_v48 = vmul.f32 %v1172_v27, %v1599_v45  ;;  %v578_v18 = vmul.f32 %v568_v4, %v1565_v21  ;;  %v602_v49 = vadd.f32 %v601_v44, %v600_v40  ;;  %v605_v50 = vrot.slane %v577_v43, 4 }
 0x20b   : > { %v585_v33 = vrot.slane %v584_v46, 1  ;;  %v595_v51 = vrot.slane %v594_v47, 2  ;;  %v751_v13 = vadd.s32 %v750_v37, %v749_v17 }
 0x20c   : > { %v1174_v52 = vpop.eup %1173  ;;  %v579_v54 = vmul.f32 %v570_v48, %v1568_v22  ;;  %v606_v39 = vadd.f32 %v605_v50, %v577_v43  ;;  %v611_v58 = vrot.slane %v578_v18, 4  ;;  %v603_v56 = vrot.slane %v602_v49, 1 }
 0x20d   : > { %v572_v20 = vmul.f32 %v1174_v52, %v1603_v53  ;;  %v596_v55 = vadd.f32 %v595_v51, %v594_v47  ;;  %v586_v59 = vadd.f32 %v585_v33, %v584_v46  ;;  %vm752_vm8 = vcmp.lt.s32.totalorder %v751_v13, 12 }
 0x20e   : > { %v607_v60 = vrot.slane %v606_v39, 2  ;;  %v612_v61 = vadd.f32 %v611_v58, %v578_v18  ;;  %v617_v45 = vrot.slane %v579_v54, 4  ;;  %v604_v5 = vadd.f32 %v603_v56, %v602_v49 }
 0x20f   : > { %v580_v21 = vmul.f32 %v572_v20, %v1573_v23  ;;  %v597_v62 = vrot.slane %v596_v55, 1  ;;  %v661_v10 = vsel %vm660_vm1, %v592_v63, %v586_v59 }
 0x210   : > { %v608_v1 = vadd.f32 %v607_v60, %v606_v39  ;;  %v613_v2 = vrot.slane %v612_v61, 2  ;;  %v618_v22 = vadd.f32 %v617_v45, %v579_v54 }
 0x211   : > { %v598_v3 = vadd.f32 %v597_v62, %v596_v55  ;;  %v623_v6 = vrot.slane %v580_v21, 4 }
 0x212   : > { %v609_v53 = vrot.slane %v608_v1, 1  ;;  %v614_v8 = vadd.f32 %v613_v2, %v612_v61  ;;  %v619_v9 = vrot.slane %v618_v22, 2 }
 0x213   : > { %v624_v11 = vadd.f32 %v623_v6, %v580_v21  ;;  %v663_v7 = vsel %vm662_vm2, %v598_v3, %v661_v10 }
 0x214   : > { %v610_v12 = vadd.f32 %v609_v53, %v608_v1  ;;  %v615_v23 = vrot.slane %v614_v8, 1  ;;  %v620_v15 = vadd.f32 %v619_v9, %v618_v22  ;;  %v665_v16 = vsel %vm664_vm3, %v604_v5, %v663_v7 }
 0x215   : > { %v625_v24 = vrot.slane %v624_v11, 2 }
 0x216   : > { %v616_v25 = vadd.f32 %v615_v23, %v614_v8  ;;  %v621_v26 = vrot.slane %v620_v15, 1  ;;  %v667_v28 = vsel %vm666_vm4, %v610_v12, %v665_v16 }
 0x217   : > { %v626_v29 = vadd.f32 %v625_v24, %v624_v11 }
 0x218   : > { %v622_v30 = vadd.f32 %v621_v26, %v620_v15  ;;  %v669_v31 = vsel %vm668_vm5, %v616_v25, %v667_v28 }
 0x219   : > { %v627_v32 = vrot.slane %v626_v29, 1 }
 0x21a   : > { %v671_v0 = vsel %vm670_vm6, %v622_v30, %v669_v31 }
 0x21b   : > { %v628_v34 = vadd.f32 %v627_v32, %v626_v29 }
 0x21d   : > { %v673_v35 = vsel %vm672_vm7, %v628_v34, %v671_v0 }
 0x21e   : > { %1065 = vmatmul.mubr.f32.vlgmr.msra.gmra.mxu1 %v673_v35 }
 0x2de   : > { %v741_v40 = vpop.f32.mrf.mxu1 }
 0x2df   : > { %v742_v41 = vadd.f32 %v938_v38, %v741_v40 }
 0x2e0   : > { %v1066_v14 = vpop.f32.mrf.mxu1 }
 0x2e1   : > { %v745_v42 = vmax.f32 %v742_v41, 0.0 }
 0x2e3   : > { %746 = vst [vmem:[%s275_s13] sm:$0xff] %v745_v42  ;;  %v755_v4 = vsel %vm752_vm8, %v745_v42, 0.0 }
 0x2e4   : > { %v756_v43 = vrot.slane %v755_v4, 4  ;;  %v762_v19 = vmul.f32 %v755_v4, %v755_v4 }
 0x2e5   : > { %1268 = shalt.err (!%p1265_p3)
}
 0x2e6   : > { %s1269_s24 = scalar_lea.hbm %s1633_s11, 128  ;;  %s1273_s10 = scalar_lea.hbm %s1698_s4, 256 }
 0x2e7   : > { %p1270_p11 = scmp.ne.s32.totalorder %s1633_s11, %s1269_s24  ;;  %p1274_p4 = scmp.lt.s32.totalorder %s1633_s11, %s1698_s4 }
 0x2e8   : > { %p1275_p6 = scmp.lt.s32.totalorder %s1273_s10, %s1269_s24 }
 0x2e9   : > { %p1271_p9 = pnand %p1270_p11, %p1716_p2 }
 0x2ea   : > { %p1276_p8 = por %p1275_p6, %p1274_p4 }
 0x2eb   : > { %p1272_p1 = pneg %p1271_p9 }
 0x2ed   : > { %p1277_p5 = pnand %p1276_p8, %p1272_p1 }
 0x2ef   : > { %1280 = shalt.err (!%p1277_p5)
}
 0x2f0   : > { %1077 = dma.vmem_to_hbm [thread:$0]  (%p1716_p2), %s1635_s14, 128, %s1633_s11, %s772_s17   ;;  %v757_v44 = vadd.f32 %v756_v43, %v755_v4  ;;  %v763_v27 = vrot.slane %v762_v19, 4 }
 0x2f1   : > { %s937_s7 = sshll.u32 %s1530_s30, 1  ;;  %s943_s28 = sshll.u32 %s1415_s22, 5 }
 0x2f2   : > { %v758_v46 = vrot.slane %v757_v44, 2  ;;  %v764_v47 = vadd.f32 %v763_v27, %v762_v19  ;;  %s282_s16 = scalar_lea.vmem [#allocation9], %s937_s7  ;;  %s801_s11 = scalar_lea.hbm %s1699_s5, %s943_s28 }
 0x2f3   : > { %s803_s8 = sshll.u32 %s282_s16, 4  ;;  %s777_s17 = scalar_lea.sflag [#allocation10], %s1530_s30  ;;  %s804_s8 = int_to_ptr.vmem [resolvable:$true] %s803_s8 }
 0x2f4   : > { %v759_v48 = vadd.f32 %v758_v46, %v757_v44  ;;  %v765_v18 = vrot.slane %v764_v47, 2  ;;  %s1281_s6 = scalar_lea.vmem %s804_s8, 32  ;;  %s1363_s24 = smov [#allocation9]  }
 0x2f5   : > { %p1282_p7 = scmp.ne.s32.totalorder %s804_s8, %s1281_s6  ;;  %s1285_s22 = sshll.u32 %s1363_s24, 4  ;;  %s1286_s22 = int_to_ptr.vmem [resolvable:$false] %s1285_s22 }
 0x2f6   : > { %v760_v49 = vrot.slane %v759_v48, 1  ;;  %v766_v50 = vadd.f32 %v765_v18, %v764_v47  ;;  %s1287_s26 = scalar_lea.vmem %s1286_s22, 64  ;;  %p1288_p0 = scmp.lt.s32.totalorder %s804_s8, %s1286_s22 }
 0x2f7   : > { %p1283_p12 = pnand %p1282_p7, %p1716_p2  ;;  %p1289_p10 = scmp.lt.s32.totalorder %s1287_s26, %s1281_s6 }
 0x2f8   : > { %v761_v33 = vadd.f32 %v760_v49, %v759_v48  ;;  %v767_v51 = vrot.slane %v766_v50, 1 }
 0x2f9   : > { %p1284_p13 = pneg %p1283_p12  ;;  %p1290_p3 = por %p1289_p10, %p1288_p0 }
 0x2fa   : > { %v768_v52 = vadd.f32 %v767_v51, %v766_v50  ;;  %769 = vst [vmem:[%s282_s16] sm:$0x1] %v761_v33 }
 0x2fb   : > { %p1291_p11 = pnand %p1290_p3, %p1284_p13 }
 0x2fc   : > { %770 = vst [vmem:[%s282_s16 + $0x1] sm:$0x1] %v768_v52 }
 0x2fd   : > { %1294 = shalt.err (!%p1291_p11)
}
 0x2fe   : > { %s1295_s9 = scalar_lea.hbm %s801_s11, 32  ;;  %s1299_s12 = scalar_lea.hbm %s1699_s5, 64 }
 0x2ff   : > { %p1296_p9 = scmp.ne.s32.totalorder %s801_s11, %s1295_s9  ;;  %p1300_p6 = scmp.lt.s32.totalorder %s801_s11, %s1699_s5 }
 0x300   : > { %p1301_p8 = scmp.lt.s32.totalorder %s1299_s12, %s1295_s9 }
 0x301   : > { %p1297_p1 = pnand %p1296_p9, %p1716_p2 }
 0x302   : > { %p1302_p5 = por %p1301_p8, %p1300_p6 }
 0x303   : > { %p1298_p4 = pneg %p1297_p1 }
 0x305   : > { %p1303_p7 = pnand %p1302_p5, %p1298_p4 }
 0x307   : > { %1306 = shalt.err (!%p1303_p7)
}
 0x308   : > { %1078 = dma.vmem_to_hbm [thread:$0]  (%p1716_p2), %s804_s8, 32, %s801_s11, %s777_s17  }
 0x309 PF: > { %s815_s28 = sand.u32 1, %s1341_s18   ;;  %p1717_p12 = scmp.ne.s32.totalorder %s1706_s25, 0 }
 0x30a   : > { %p1718_p13 = scmp.ge.s32.totalorder %s1353_s21, 2  ;;  %s816_s16 = scalar_lea.sflag [#allocation4], %s815_s28 }
 0x30c   : > { %p1093_p0 = pnand %p1718_p13, %p1717_p12 }
 0x30e   : > { %p1094_p10 = pneg %p1093_p0 }
 0x310   : > { %1332 = dma.done.wait (%p1094_p10), %s816_s16, 128  }
 0x311   : > { %1334 = vsyncadd (%p1094_p10), %s816_s16, 4294967168  ;;  %s825_s29 = scalar_lea.sflag [#allocation10], %s815_s28 }
 0x312   : > { %1336 = dma.done.wait (%p1094_p10), %s825_s29, 32  }
 0x313   : > { %1338 = vsyncadd (%p1094_p10), %s825_s29, 4294967264  ;;  %p23_p2 = scmp.ge.s32.totalorder %s1472_s15, 4   ;;  %s1719_s18 = smov %s1345_s19 }
 0x314   : > { %s1720_s19 = smov %s1349_s20  ;;  %s1721_s20 = smov %s1488_s27 }
 0x315   : > { %s1722_s21 = smov %s1472_s15  ;;  %25 = sbr.rel (!%p23_p2) target bundleno = 8 (0x8), region = 106 }
 0x31a   :  { %830 = vsyncpa [#allocation3], 1 }
 0x31b   :  { %832 = vsyncpa [#allocation3 + $0x1], 1 }
 0x31c   :  { %833 = vsyncpa [#allocation6], 1 }
 0x31d   :  { %834 = vsyncpa [#allocation4], 1 }
 0x31e   :  { %836 = vsyncpa [#allocation4 + $0x1], 1 }
 0x31f   :  { %837 = vsyncpa [#allocation10], 1 }
 0x320   :  { %839 = vsyncpa [#allocation10 + $0x1], 1 }

</bundles_post_ra>
